<compile_context>
chip_gen: v6e
topology: v6e:2x2x1
jax: 0.10.0
libtpu: 0.0.40
codegen_flags: <defaults>
</compile_context>

<pallas_src>
import math
import numpy as np
import jax
import jax.numpy as jnp
from jax.experimental import pallas as pl
from jax.experimental.pallas import tpu as pltpu

# ---------------- scaled-down Whisper-style constants ----------------
SAMPLE_RATE   = 1600          # (Whisper: 16000)
N_FFT         = 64            # (Whisper: 400)
HOP_LENGTH    = 16            # (Whisper: 160)
N_FREQ        = N_FFT // 2 + 1
N_FREQ_PAD    = 64            # freq bins zero-padded to a full 64 lanes per DFT half
N_MELS        = 16            # (Whisper: 80)
N_SAMPLES_PAD = 256           # (Whisper: N_SAMPLES = 480000)
N_FRAMES      = 48            # (Whisper: 3000)
PREPEND_SIZE  = 256           # (module default: 10240)

D_MODEL = 32
VOCAB   = 64
SOT_LEN = 4                   # sot_sequence_including_notimestamps length


# ---------------- fused Pallas kernel ----------------
def _make_fused_kernel(B, n_frames, L):
    """Build the fused kernel for static batch B, per-batch STFT frame count
    n_frames and decoder length L."""

    def kernel(frames_ref, dft_ref, melfb_ref, emb_ref, wenc_ref, wout_ref, out_ref):
        # ---- 1) windowed DFT (cos|sin packed as one 128-lane weight) ----
        f = frames_ref[...]                                              # [B*nF, N_FFT]
        z = jnp.dot(f, dft_ref[...], preferred_element_type=jnp.float32)  # [B*nF, 128]
        re = z[:, :N_FREQ_PAD]
        im = z[:, N_FREQ_PAD:]
        power = re * re + im * im                                        # [B*nF, 64]

        # ---- 2) mel filterbank + log10 ----
        mel = jnp.dot(power, melfb_ref[...],
                      preferred_element_type=jnp.float32)                # [B*nF, N_MELS]
        log_spec = jnp.log10(jnp.maximum(mel, 1e-10))

        # ---- 3) Whisper normalization with the global (whole-batch) max,
        #          done entirely in-register (no extra kernel / HBM trip) ----
        gmax = jnp.max(log_spec, keepdims=True)                          # [1, 1]
        log_spec = jnp.maximum(log_spec, gmax - 8.0)
        log_spec = (log_spec + 4.0) / 4.0

        # ---- 4) synthetic whisper head (encoder + cross-attn + vocab proj),
        #          statically unrolled over the tiny batch ----
        # TODO(synk): the real whisper_model.model.forward (conv stack +
        # transformer encoder/decoder) is an external pretrained dependency;
        # replaced by this small deterministic stand-in.
        wenc = wenc_ref[...]                                             # [N_MELS, D]
        wout = wout_ref[...]                                             # [D, VOCAB]
        emb  = emb_ref[...]                                              # [B*L, D]
        outs = []
        for b in range(B):
            # pad_or_trim on the frame axis (static slice / zero pad)
            n_keep = min(n_frames, N_FRAMES)
            x_b = log_spec[b * n_frames: b * n_frames + n_keep, :]       # [<=N_FRAMES, N_MELS]
            if n_frames < N_FRAMES:
                x_b = jnp.concatenate(
                    [x_b, jnp.zeros((N_FRAMES - n_frames, N_MELS), jnp.float32)], axis=0)

            enc = jax.nn.gelu(jnp.dot(x_b, wenc,
                                      preferred_element_type=jnp.float32))   # [N_FRAMES, D]
            emb_b = emb[b * L:(b + 1) * L, :]                                # [L, D]
            scores = jax.lax.dot_general(
                emb_b, enc, (((1,), (1,)), ((), ())),
                preferred_element_type=jnp.float32) * (1.0 / math.sqrt(D_MODEL))  # [L, N_FRAMES]
            scores = scores - jnp.max(scores, axis=-1, keepdims=True)
            p = jnp.exp(scores)
            attn = p * pl.reciprocal(jnp.sum(p, axis=-1, keepdims=True), approx=True)
            ctx = jnp.dot(attn, enc, preferred_element_type=jnp.float32)     # [L, D]
            outs.append(jnp.dot(emb_b + ctx, wout,
                                preferred_element_type=jnp.float32))         # [L, VOCAB]

        # single dense store: [B*L, VOCAB] (8 sublanes x 64 lanes at defaults)
        out_ref[...] = jnp.concatenate(outs, axis=0)

    return kernel


# ---------------- forward wrapper ----------------
def prepend_safety_filter_forward(audio_vector, params, decoder_input=None):
    """Mirrors PrependSafetyFilter.forward: prepend learned segment, log-mel
    spectrogram (Whisper semantics), pad_or_trim, decoder-id construction and
    the (synthetic) whisper forward -> logits [B, L, VOCAB]."""
    B = audio_vector.shape[0]

    # prepend learned segment
    X = jnp.broadcast_to(params["prepend_segment"][None, :], (B, PREPEND_SIZE))
    audio = jnp.concatenate([X, audio_vector], axis=1)                   # [B, T]
    T = audio.shape[1]

    # whisper: F.pad(audio, (0, N_SAMPLES)), torch.stft(center=True, hann),
    # drop the last frame  ->  n_frames = (T + N_SAMPLES) // HOP
    padded = jnp.pad(audio, ((0, 0), (0, N_SAMPLES_PAD)))
    padded = jnp.pad(padded, ((0, 0), (N_FFT // 2, N_FFT // 2)), mode="reflect")
    n_frames = (T + N_SAMPLES_PAD) // HOP_LENGTH

    # overlapped frames via static slices (no gather):
    # frame f = rows f .. f + N_FFT/HOP - 1 of the hop-reshaped signal
    n_rows = n_frames + N_FFT // HOP_LENGTH - 1
    rows = padded[:, : n_rows * HOP_LENGTH].reshape(B, n_rows, HOP_LENGTH)
    frames = jnp.concatenate(
        [rows[:, i: i + n_frames, :] for i in range(N_FFT // HOP_LENGTH)],
        axis=-1)                                                         # [B, n_frames, N_FFT]
    frames_flat = frames.reshape(B * n_frames, N_FFT)                    # [B*nF, N_FFT]

    # decoder ids: sot sequence (+ optional extra decoder input), embedding gather (glue)
    dec_ids = jnp.broadcast_to(params["sot_ids"][None, :], (B, SOT_LEN))
    if decoder_input is not None:
        dec_ids = jnp.concatenate([dec_ids, decoder_input], axis=1)
    L = dec_ids.shape[1]
    emb_flat = params["tok_emb"][dec_ids].reshape(B * L, D_MODEL)        # [B*L, D]

    vmem = pl.BlockSpec(memory_space=pltpu.MemorySpace.VMEM)
    logits_flat = pl.pallas_call(
        _make_fused_kernel(B, n_frames, L),
        out_shape=jax.ShapeDtypeStruct((B * L, VOCAB), jnp.float32),
        in_specs=[vmem] * 6,
        out_specs=vmem,
    )(frames_flat, params["dft_packed"], params["mel_fb"],
      emb_flat, params["w_enc"], params["w_out"])

    return logits_flat.reshape(B, L, VOCAB)


# ---------------- deterministic parameter construction ----------------
def make_dft_packed():
    """[N_FFT, 2*N_FREQ_PAD] = [cos | sin] windowed DFT, each half zero-padded
    from N_FREQ=33 to 64 columns so the matmul output is exactly 128 lanes."""
    n = np.arange(N_FFT)
    k = np.arange(N_FREQ)
    window = 0.5 * (1.0 - np.cos(2.0 * np.pi * n / N_FFT))               # periodic hann
    angle = 2.0 * np.pi * np.outer(n, k) / N_FFT
    packed = np.zeros((N_FFT, 2 * N_FREQ_PAD), dtype=np.float32)
    packed[:, :N_FREQ] = window[:, None] * np.cos(angle)
    packed[:, N_FREQ_PAD:N_FREQ_PAD + N_FREQ] = window[:, None] * np.sin(angle)
    return jnp.asarray(packed)


def make_mel_filters():
    """Triangular mel filterbank, rows zero-padded N_FREQ=33 -> 64 to match the
    padded power spectrum."""
    def hz_to_mel(f): return 2595.0 * np.log10(1.0 + f / 700.0)
    def mel_to_hz(m): return 700.0 * (10.0 ** (m / 2595.0) - 1.0)
    mels = np.linspace(hz_to_mel(0.0), hz_to_mel(SAMPLE_RATE / 2), N_MELS + 2)
    bins = np.floor((N_FFT + 1) * mel_to_hz(mels) / SAMPLE_RATE).astype(int)
    fb = np.zeros((N_FREQ_PAD, N_MELS), dtype=np.float32)
    for m in range(1, N_MELS + 1):
        l, c, r = bins[m - 1], bins[m], bins[m + 1]
        for kk in range(l, c):
            if c > l:
                fb[kk, m - 1] = (kk - l) / (c - l)
        for kk in range(c, r):
            if r > c:
                fb[kk, m - 1] = (r - kk) / (r - c)
    return jnp.asarray(fb)


def init_params(key):
    k0, k1, k2, k3 = jax.random.split(key, 4)
    return {
        "prepend_segment": jax.random.uniform(k0, (PREPEND_SIZE,), jnp.float32),  # torch.rand
        "dft_packed": make_dft_packed(),
        "mel_fb": make_mel_filters(),
        "sot_ids": jnp.array([1, 2, 3, 4], dtype=jnp.int32),             # synthetic sot sequence
        "tok_emb": 0.02 * jax.random.normal(k1, (VOCAB, D_MODEL), jnp.float32),
        "w_enc": 0.1 * jax.random.normal(k2, (N_MELS, D_MODEL), jnp.float32),
        "w_out": 0.1 * jax.random.normal(k3, (D_MODEL, VOCAB), jnp.float32),
    }


# ---------------- main ----------------
if __name__ == "__main__":
    key = jax.random.PRNGKey(0)
    params = init_params(key)

    B, AUDIO_LEN = 2, 512
    audio = jax.random.uniform(jax.random.PRNGKey(42), (B, AUDIO_LEN), jnp.float32) * 2.0 - 1.0

    logits = jax.jit(lambda a: prepend_safety_filter_forward(a, params))(audio)
    logits = jax.block_until_ready(logits)

    assert logits.shape == (B, SOT_LEN, VOCAB), logits.shape
    assert bool(jnp.all(jnp.isfinite(logits)))
    print("KERNEL_OK")
</pallas_src>

<mosaic_0001>
module attributes {stable_mosaic.version = 11 : i64} {
  func.func @kernel(%arg0: memref<128x64xf32, #tpu.memory_space<vmem>>, %arg1: memref<64x128xf32, #tpu.memory_space<vmem>>, %arg2: memref<64x16xf32, #tpu.memory_space<vmem>>, %arg3: memref<8x32xf32, #tpu.memory_space<vmem>>, %arg4: memref<16x32xf32, #tpu.memory_space<vmem>>, %arg5: memref<32x64xf32, #tpu.memory_space<vmem>>, %arg6: memref<8x64xf32, #tpu.memory_space<vmem>>) attributes {dimension_semantics = [], scalar_prefetch = 0 : i64, scratch_operands = 0 : i64, tpu.core_type = #tpu.core_type<tc>} {
    %c0 = arith.constant 0 : index
    %c0_0 = arith.constant 0 : index
    %0 = vector.load %arg0[%c0, %c0_0] : memref<128x64xf32, #tpu.memory_space<vmem>>, vector<128x64xf32>
    %c0_1 = arith.constant 0 : index
    %c0_2 = arith.constant 0 : index
    %1 = vector.load %arg1[%c0_1, %c0_2] : memref<64x128xf32, #tpu.memory_space<vmem>>, vector<64x128xf32>
    %cst = arith.constant dense<0.000000e+00> : vector<128x128xf32>
    %2 = tpu.matmul %0, %1, %cst {dimension_numbers = #tpu.dot_dimension_numbers<[1], [0], [0], [1], [0, 0, 1, 1], [], []>} : vector<128x64xf32>, vector<64x128xf32>, vector<128x128xf32> -> vector<128x128xf32>
    %3 = vector.extract_strided_slice %2 {offsets = [0, 0], sizes = [128, 64], strides = [1, 1]} : vector<128x128xf32> to vector<128x64xf32>
    %4 = vector.extract_strided_slice %2 {offsets = [0, 64], sizes = [128, 64], strides = [1, 1]} : vector<128x128xf32> to vector<128x64xf32>
    %5 = arith.mulf %3, %3 : vector<128x64xf32>
    %6 = arith.mulf %4, %4 : vector<128x64xf32>
    %7 = arith.addf %5, %6 : vector<128x64xf32>
    %c0_3 = arith.constant 0 : index
    %c0_4 = arith.constant 0 : index
    %8 = vector.load %arg2[%c0_3, %c0_4] : memref<64x16xf32, #tpu.memory_space<vmem>>, vector<64x16xf32>
    %cst_5 = arith.constant dense<0.000000e+00> : vector<128x16xf32>
    %9 = tpu.matmul %7, %8, %cst_5 {dimension_numbers = #tpu.dot_dimension_numbers<[1], [0], [0], [1], [0, 0, 1, 1], [], []>} : vector<128x64xf32>, vector<64x16xf32>, vector<128x16xf32> -> vector<128x16xf32>
    %cst_6 = arith.constant 1.000000e-10 : f32
    %10 = vector.broadcast %cst_6 : f32 to vector<128x16xf32>
    %11 = arith.maximumf %9, %10 : vector<128x16xf32>
    %12 = math.log %11 : vector<128x16xf32>
    %cst_7 = arith.constant 0.434294492 : f32
    %13 = vector.broadcast %cst_7 : f32 to vector<128x16xf32>
    %14 = arith.mulf %12, %13 : vector<128x16xf32>
    %15 = vector.shape_cast %14 : vector<128x16xf32> to vector<1x128x16xf32>
    %cst_8 = arith.constant dense<0xFF800000> : vector<1xf32>
    %16 = vector.multi_reduction <maximumf>, %15, %cst_8 [1, 2] : vector<1x128x16xf32> to vector<1xf32>
    %17 = vector.shape_cast %16 : vector<1xf32> to vector<1x1x1xf32>
    %18 = vector.extract %17[0, 0, 0] : f32 from vector<1x1x1xf32>
    %19 = vector.broadcast %18 : f32 to vector<1x1xf32>
    %cst_9 = arith.constant 8.000000e+00 : f32
    %20 = vector.broadcast %cst_9 : f32 to vector<1x1xf32>
    %21 = arith.subf %19, %20 : vector<1x1xf32>
    %22 = vector.broadcast %21 : vector<1x1xf32> to vector<128x16xf32>
    %23 = arith.maximumf %14, %22 : vector<128x16xf32>
    %cst_10 = arith.constant 4.000000e+00 : f32
    %24 = vector.broadcast %cst_10 : f32 to vector<128x16xf32>
    %25 = arith.addf %23, %24 : vector<128x16xf32>
    %cst_11 = arith.constant 4.000000e+00 : f32
    %26 = vector.broadcast %cst_11 : f32 to vector<128x16xf32>
    %27 = arith.divf %25, %26 : vector<128x16xf32>
    %c0_12 = arith.constant 0 : index
    %c0_13 = arith.constant 0 : index
    %28 = vector.load %arg4[%c0_12, %c0_13] : memref<16x32xf32, #tpu.memory_space<vmem>>, vector<16x32xf32>
    %c0_14 = arith.constant 0 : index
    %c0_15 = arith.constant 0 : index
    %29 = vector.load %arg5[%c0_14, %c0_15] : memref<32x64xf32, #tpu.memory_space<vmem>>, vector<32x64xf32>
    %c0_16 = arith.constant 0 : index
    %c0_17 = arith.constant 0 : index
    %30 = vector.load %arg3[%c0_16, %c0_17] : memref<8x32xf32, #tpu.memory_space<vmem>>, vector<8x32xf32>
    %31 = vector.extract_strided_slice %27 {offsets = [0, 0], sizes = [48, 16], strides = [1, 1]} : vector<128x16xf32> to vector<48x16xf32>
    %cst_18 = arith.constant dense<0.000000e+00> : vector<48x32xf32>
    %32 = tpu.matmul %31, %28, %cst_18 {dimension_numbers = #tpu.dot_dimension_numbers<[1], [0], [0], [1], [0, 0, 1, 1], [], []>} : vector<48x16xf32>, vector<16x32xf32>, vector<48x32xf32> -> vector<48x32xf32>
    %33 = arith.mulf %32, %32 : vector<48x32xf32>
    %34 = arith.mulf %32, %33 : vector<48x32xf32>
    %cst_19 = arith.constant 4.471500e-02 : f32
    %35 = vector.broadcast %cst_19 : f32 to vector<48x32xf32>
    %36 = arith.mulf %35, %34 : vector<48x32xf32>
    %37 = arith.addf %32, %36 : vector<48x32xf32>
    %cst_20 = arith.constant 0.797884583 : f32
    %38 = vector.broadcast %cst_20 : f32 to vector<48x32xf32>
    %39 = arith.mulf %38, %37 : vector<48x32xf32>
    %40 = math.tanh %39 : vector<48x32xf32>
    %cst_21 = arith.constant 1.000000e+00 : f32
    %41 = vector.broadcast %cst_21 : f32 to vector<48x32xf32>
    %42 = arith.addf %41, %40 : vector<48x32xf32>
    %cst_22 = arith.constant 5.000000e-01 : f32
    %43 = vector.broadcast %cst_22 : f32 to vector<48x32xf32>
    %44 = arith.mulf %43, %42 : vector<48x32xf32>
    %45 = arith.mulf %32, %44 : vector<48x32xf32>
    %46 = vector.extract_strided_slice %30 {offsets = [0, 0], sizes = [4, 32], strides = [1, 1]} : vector<8x32xf32> to vector<4x32xf32>
    %cst_23 = arith.constant dense<0.000000e+00> : vector<4x48xf32>
    %47 = tpu.matmul %46, %45, %cst_23 {dimension_numbers = #tpu.dot_dimension_numbers<[1], [1], [0], [0], [0, 0, 1, 0], [], []>} : vector<4x32xf32>, vector<48x32xf32>, vector<4x48xf32> -> vector<4x48xf32>
    %cst_24 = arith.constant 0.176776692 : f32
    %48 = vector.broadcast %cst_24 : f32 to vector<4x48xf32>
    %49 = arith.mulf %47, %48 : vector<4x48xf32>
    %cst_25 = arith.constant dense<0xFF800000> : vector<4xf32>
    %50 = vector.multi_reduction <maximumf>, %49, %cst_25 [1] : vector<4x48xf32> to vector<4xf32>
    %51 = vector.shape_cast %50 : vector<4xf32> to vector<4x1xf32>
    %52 = vector.broadcast %51 : vector<4x1xf32> to vector<4x48xf32>
    %53 = arith.subf %49, %52 : vector<4x48xf32>
    %54 = math.exp %53 : vector<4x48xf32>
    %cst_26 = arith.constant dense<0.000000e+00> : vector<4xf32>
    %55 = vector.multi_reduction <add>, %54, %cst_26 [1] : vector<4x48xf32> to vector<4xf32>
    %56 = vector.shape_cast %55 : vector<4xf32> to vector<4x1xf32>
    %57 = tpu.reciprocal %56 {approx = true} : vector<4x1xf32> -> vector<4x1xf32>
    %58 = vector.broadcast %57 : vector<4x1xf32> to vector<4x48xf32>
    %59 = arith.mulf %54, %58 : vector<4x48xf32>
    %cst_27 = arith.constant dense<0.000000e+00> : vector<4x32xf32>
    %60 = tpu.matmul %59, %45, %cst_27 {dimension_numbers = #tpu.dot_dimension_numbers<[1], [0], [0], [1], [0, 0, 1, 1], [], []>} : vector<4x48xf32>, vector<48x32xf32>, vector<4x32xf32> -> vector<4x32xf32>
    %61 = arith.addf %46, %60 : vector<4x32xf32>
    %cst_28 = arith.constant dense<0.000000e+00> : vector<4x64xf32>
    %62 = tpu.matmul %61, %29, %cst_28 {dimension_numbers = #tpu.dot_dimension_numbers<[1], [0], [0], [1], [0, 0, 1, 1], [], []>} : vector<4x32xf32>, vector<32x64xf32>, vector<4x64xf32> -> vector<4x64xf32>
    %63 = vector.extract_strided_slice %27 {offsets = [64, 0], sizes = [48, 16], strides = [1, 1]} : vector<128x16xf32> to vector<48x16xf32>
    %cst_29 = arith.constant dense<0.000000e+00> : vector<48x32xf32>
    %64 = tpu.matmul %63, %28, %cst_29 {dimension_numbers = #tpu.dot_dimension_numbers<[1], [0], [0], [1], [0, 0, 1, 1], [], []>} : vector<48x16xf32>, vector<16x32xf32>, vector<48x32xf32> -> vector<48x32xf32>
    %65 = arith.mulf %64, %64 : vector<48x32xf32>
    %66 = arith.mulf %64, %65 : vector<48x32xf32>
    %cst_30 = arith.constant 4.471500e-02 : f32
    %67 = vector.broadcast %cst_30 : f32 to vector<48x32xf32>
    %68 = arith.mulf %67, %66 : vector<48x32xf32>
    %69 = arith.addf %64, %68 : vector<48x32xf32>
    %cst_31 = arith.constant 0.797884583 : f32
    %70 = vector.broadcast %cst_31 : f32 to vector<48x32xf32>
    %71 = arith.mulf %70, %69 : vector<48x32xf32>
    %72 = math.tanh %71 : vector<48x32xf32>
    %cst_32 = arith.constant 1.000000e+00 : f32
    %73 = vector.broadcast %cst_32 : f32 to vector<48x32xf32>
    %74 = arith.addf %73, %72 : vector<48x32xf32>
    %cst_33 = arith.constant 5.000000e-01 : f32
    %75 = vector.broadcast %cst_33 : f32 to vector<48x32xf32>
    %76 = arith.mulf %75, %74 : vector<48x32xf32>
    %77 = arith.mulf %64, %76 : vector<48x32xf32>
    %78 = vector.extract_strided_slice %30 {offsets = [4, 0], sizes = [4, 32], strides = [1, 1]} : vector<8x32xf32> to vector<4x32xf32>
    %cst_34 = arith.constant dense<0.000000e+00> : vector<4x48xf32>
    %79 = tpu.matmul %78, %77, %cst_34 {dimension_numbers = #tpu.dot_dimension_numbers<[1], [1], [0], [0], [0, 0, 1, 0], [], []>} : vector<4x32xf32>, vector<48x32xf32>, vector<4x48xf32> -> vector<4x48xf32>
    %cst_35 = arith.constant 0.176776692 : f32
    %80 = vector.broadcast %cst_35 : f32 to vector<4x48xf32>
    %81 = arith.mulf %79, %80 : vector<4x48xf32>
    %cst_36 = arith.constant dense<0xFF800000> : vector<4xf32>
    %82 = vector.multi_reduction <maximumf>, %81, %cst_36 [1] : vector<4x48xf32> to vector<4xf32>
    %83 = vector.shape_cast %82 : vector<4xf32> to vector<4x1xf32>
    %84 = vector.broadcast %83 : vector<4x1xf32> to vector<4x48xf32>
    %85 = arith.subf %81, %84 : vector<4x48xf32>
    %86 = math.exp %85 : vector<4x48xf32>
    %cst_37 = arith.constant dense<0.000000e+00> : vector<4xf32>
    %87 = vector.multi_reduction <add>, %86, %cst_37 [1] : vector<4x48xf32> to vector<4xf32>
    %88 = vector.shape_cast %87 : vector<4xf32> to vector<4x1xf32>
    %89 = tpu.reciprocal %88 {approx = true} : vector<4x1xf32> -> vector<4x1xf32>
    %90 = vector.broadcast %89 : vector<4x1xf32> to vector<4x48xf32>
    %91 = arith.mulf %86, %90 : vector<4x48xf32>
    %cst_38 = arith.constant dense<0.000000e+00> : vector<4x32xf32>
    %92 = tpu.matmul %91, %77, %cst_38 {dimension_numbers = #tpu.dot_dimension_numbers<[1], [0], [0], [1], [0, 0, 1, 1], [], []>} : vector<4x48xf32>, vector<48x32xf32>, vector<4x32xf32> -> vector<4x32xf32>
    %93 = arith.addf %78, %92 : vector<4x32xf32>
    %cst_39 = arith.constant dense<0.000000e+00> : vector<4x64xf32>
    %94 = tpu.matmul %93, %29, %cst_39 {dimension_numbers = #tpu.dot_dimension_numbers<[1], [0], [0], [1], [0, 0, 1, 1], [], []>} : vector<4x32xf32>, vector<32x64xf32>, vector<4x64xf32> -> vector<4x64xf32>
    %95 = tpu.concatenate %62, %94 in 0 : vector<4x64xf32>, vector<4x64xf32> -> vector<8x64xf32>
    %c0_40 = arith.constant 0 : index
    %c0_41 = arith.constant 0 : index
    %96 = vector.load %arg6[%c0_40, %c0_41] : memref<8x64xf32, #tpu.memory_space<vmem>>, vector<8x64xf32>
    tpu.vector_store %arg6[%c0_40, %c0_41], %95 {strides = array<i32>} : memref<8x64xf32, #tpu.memory_space<vmem>>, vector<8x64xf32>,
    return
  }
}

</mosaic_0001>

<bundles_post_ra>
// kernel: _lambda_.1
= control target key start
LH: loop header
LB: loop body
LE: loop exit
PB: predicated region body
PF: predicated region fallthrough
CT: control target
= control target key end

     0   :  { %vm48_vm0 = vcmask 523264   ;;  %s2432_s0 = inlined_call_operand.vmem [shape: f32[128,64], index: 0, kind: input, shape index: {}]   ;;  %s2433_s1 = inlined_call_operand.vmem [shape: f32[64,128], index: 1, kind: input, shape index: {}]   ;;  %s2434_s2 = inlined_call_operand.vmem [shape: f32[64,16], index: 2, kind: input, shape index: {}]   ;;  %s2435_s3 = inlined_call_operand.vmem [shape: f32[8,32], index: 3, kind: input, shape index: {}]   ;;  %s2436_s4 = inlined_call_operand.vmem [shape: f32[16,32], index: 4, kind: input, shape index: {}]   ;;  %s2437_s5 = inlined_call_operand.vmem [shape: f32[32,64], index: 5, kind: input, shape index: {}]   ;;  %s2438_s6 = inlined_call_operand.hbm [shape: f32[8,64], index: 6, kind: output, shape index: {}]  }
   0x1   :  { %v47_v0 = vld [vmem:[%s2433_s1 + $0x38] sm:$0xff]  ;;  %v46_v1 = vld [vmem:[%s2433_s1 + $0x30] sm:$0xff]  ;;  %v45_v2 = vld [vmem:[%s2433_s1 + $0x28] sm:$0xff] }
   0x2   :  { %1716 = vmatprep.subr.mxu0 %v47_v0  ;;  %v24_v3 = vld [vmem:[%s2432_s0] sm:$0xff]  ;;  %v43_v5 = vld [vmem:[%s2433_s1 + $0x18] sm:$0xff]  ;;  %v42_v6 = vld [vmem:[%s2433_s1 + $0x10] sm:$0xff] }
   0x3   :  { %1717 = vmatpush3.msra.mxu0 %v47_v0  ;;  %1732 = vmatprep.mubr.msk.f32.mxu0 %vm48_vm0, %v24_v3  ;;  %v44_v4 = vld [vmem:[%s2433_s1 + $0x20] sm:$0xff] }
   0x4   :  { %1718 = vmatprep.subr.mxu0 %v46_v1 }
   0x5   :  { %1719 = vmatpush3.msra.mxu0 %v46_v1 }
   0x6   :  { %1720 = vmatprep.subr.mxu0 %v45_v2 }
   0x7   :  { %1721 = vmatpush3.msra.mxu0 %v45_v2 }
   0x8   :  { %1722 = vmatprep.subr.mxu0 %v44_v4 }
   0x9   :  { %1723 = vmatpush3.msra.mxu0 %v44_v4 }
   0xa   :  { %11 = vsyncpa [#allocation3], 0  ;;  %1724 = vmatprep.subr.mxu0 %v43_v5  ;;  %v41_v7 = vld [vmem:[%s2433_s1 + $0x8] sm:$0xff]  ;;  %v40_v8 = vld [vmem:[%s2433_s1] sm:$0xff]  ;;  %s1996_s10 = smov 64   ;;  %vm603_vm1 = vcmask 130048  }
   0xb   :  { %1725 = vmatpush3.msra.mxu0 %v43_v5  ;;  %v25_v9 = vld [vmem:[%s2432_s0 + $0x8] sm:$0xff]  ;;  %v26_v10 = vld [vmem:[%s2432_s0 + $0x10] sm:$0xff]  ;;  %v27_v11 = vld [vmem:[%s2432_s0 + $0x18] sm:$0xff]  ;;  %vm1998_vm2 = vmmov 0   ;;  %vm857_vm3 = vcmask 261120   ;;  %vm950_vm4 = vcmask 388096  }
   0xc   :  { %1726 = vmatprep.subr.mxu0 %v42_v6  ;;  %v28_v12 = vld [vmem:[%s2432_s0 + $0x20] sm:$0xff]  ;;  %v29_v13 = vld [vmem:[%s2432_s0 + $0x28] sm:$0xff]  ;;  %v30_v14 = vld [vmem:[%s2432_s0 + $0x30] sm:$0xff]  ;;  %vm962_vm5 = vcmask 392192   ;;  %vm1534_vm6 = vcmask 1043456  }
   0xd   :  { %1727 = vmatpush3.msra.mxu0 %v42_v6  ;;  %v31_v15 = vld [vmem:[%s2432_s0 + $0x38] sm:$0xff]  ;;  %v32_v16 = vld [vmem:[%s2432_s0 + $0x40] sm:$0xff]  ;;  %v33_v17 = vld [vmem:[%s2432_s0 + $0x48] sm:$0xff] }
   0xe   :  { %1728 = vmatprep.subr.mxu0 %v41_v7  ;;  %v34_v18 = vld [vmem:[%s2432_s0 + $0x50] sm:$0xff]  ;;  %v35_v19 = vld [vmem:[%s2432_s0 + $0x58] sm:$0xff]  ;;  %v36_v20 = vld [vmem:[%s2432_s0 + $0x60] sm:$0xff] }
   0xf   :  { %1729 = vmatpush3.msra.mxu0 %v41_v7  ;;  %v37_v21 = vld [vmem:[%s2432_s0 + $0x68] sm:$0xff]  ;;  %v38_v22 = vld [vmem:[%s2432_s0 + $0x70] sm:$0xff]  ;;  %v39_v23 = vld [vmem:[%s2432_s0 + $0x78] sm:$0xff] }
  0x10   :  { %1730 = vmatprep.subr.mxu0 %v40_v8  ;;  %v345_v24 = vld [vmem:[%s2434_s2 + $0x38] sm:$0xff]  ;;  %v344_v25 = vld [vmem:[%s2434_s2 + $0x30] sm:$0xff]  ;;  %v343_v26 = vld [vmem:[%s2434_s2 + $0x28] sm:$0xff] }
  0x11   :  { %1731 = vmatpush3.msra.mxu0 %v40_v8  ;;  %1756 = vmatprep.subr.mxu1 %v345_v24  ;;  %v342_v27 = vld [vmem:[%s2434_s2 + $0x20] sm:$0xff]  ;;  %v341_v28 = vld [vmem:[%s2434_s2 + $0x18] sm:$0xff]  ;;  %v340_v29 = vld [vmem:[%s2434_s2 + $0x10] sm:$0xff] }
  0x12   :  { %1733 = vmatmul.mubr.msk.f32.vlgmr.msra.gmra.mxu0 %vm48_vm0, %v25_v9  ;;  %1757 = vmatpush3.msra.mxu1 %v345_v24  ;;  %v339_v30 = vld [vmem:[%s2434_s2 + $0x8] sm:$0xff]  ;;  %v338_v31 = vld [vmem:[%s2434_s2] sm:$0xff] }
  0x13   :  { %1735 = vmatprep.mubr.msk.f32.mxu0 %vm48_vm0, %v26_v10  ;;  %1758 = vmatprep.subr.mxu1 %v344_v25 }
  0x14   :  { %1759 = vmatpush3.msra.mxu1 %v344_v25 }
  0x15   :  { %1760 = vmatprep.subr.mxu1 %v343_v26 }
  0x16   :  { %1736 = vmatmul.mubr.msk.f32.gmra.mxu0 %vm48_vm0, %v27_v11  ;;  %1761 = vmatpush3.msra.mxu1 %v343_v26 }
  0x17   :  { %1738 = vmatprep.mubr.msk.f32.mxu0 %vm48_vm0, %v28_v12  ;;  %1762 = vmatprep.subr.mxu1 %v342_v27 }
  0x18   :  { %1763 = vmatpush3.msra.mxu1 %v342_v27 }
  0x19   :  { %1764 = vmatprep.subr.mxu1 %v341_v28 }
  0x1a   :  { %1739 = vmatmul.mubr.msk.f32.gmra.mxu0 %vm48_vm0, %v29_v13  ;;  %1765 = vmatpush3.msra.mxu1 %v341_v28 }
  0x1b   :  { %1741 = vmatprep.mubr.msk.f32.mxu0 %vm48_vm0, %v30_v14  ;;  %1766 = vmatprep.subr.mxu1 %v340_v29 }
  0x1c   :  { %1767 = vmatpush3.msra.mxu1 %v340_v29 }
  0x1d   :  { %1768 = vmatprep.subr.mxu1 %v339_v30 }
  0x1e   :  { %1742 = vmatmul.mubr.msk.f32.gmra.mxu0 %vm48_vm0, %v31_v15  ;;  %1769 = vmatpush3.msra.mxu1 %v339_v30 }
  0x1f   :  { %1744 = vmatprep.mubr.msk.f32.mxu0 %vm48_vm0, %v32_v16  ;;  %1770 = vmatprep.subr.mxu1 %v338_v31 }
  0x20   :  { %1771 = vmatpush3.msra.mxu1 %v338_v31 }
  0x22   :  { %1745 = vmatmul.mubr.msk.f32.gmra.mxu0 %vm48_vm0, %v33_v17 }
  0x23   :  { %1747 = vmatprep.mubr.msk.f32.mxu0 %vm48_vm0, %v34_v18 }
  0x26   :  { %1748 = vmatmul.mubr.msk.f32.gmra.mxu0 %vm48_vm0, %v35_v19 }
  0x27   :  { %1750 = vmatprep.mubr.msk.f32.mxu0 %vm48_vm0, %v36_v20 }
  0x2a   :  { %1751 = vmatmul.mubr.msk.f32.gmra.mxu0 %vm48_vm0, %v37_v21 }
  0x2b   :  { %1753 = vmatprep.mubr.msk.f32.mxu0 %vm48_vm0, %v38_v22 }
  0x2e   :  { %1754 = vmatmul.mubr.msk.f32.gmra.mxu0 %vm48_vm0, %v39_v23 }
  0xd2   :  { %v1734_v32 = vpop.f32.mrf.mxu0 }
  0xd3   :  { %v243_v37 = vmul.f32 %v1734_v32, %v1734_v32 }
  0xd4   :  { %v163_v33 = vpop.f32.mrf.mxu0 }
  0xd5   :  { %v242_v34 = vmul.f32 %v163_v33, %v163_v33 }
  0xd6   :  { %v1737_v35 = vpop.f32.mrf.mxu0 }
  0xd7   :  { %274 = vrot.lane.b32.xlu0 %v242_v34, %s1996_s10  ;;  %v245_v41 = vmul.f32 %v1737_v35, %v1737_v35 }
  0xd8   :  { %v173_v36 = vpop.f32.mrf.mxu0 }
  0xd9   :  { %v244_v38 = vmul.f32 %v173_v36, %v173_v36 }
  0xda   :  { %v1740_v39 = vpop.f32.mrf.mxu0 }
  0xdb   :  { %276 = vrot.lane.b32.xlu0 %v243_v37, %s1996_s10  ;;  %278 = vrot.lane.b32.xlu1 %v244_v38, %s1996_s10  ;;  %v247_v45 = vmul.f32 %v1740_v39, %v1740_v39 }
  0xdc   :  { %v183_v40 = vpop.f32.mrf.mxu0 }
  0xdd   :  { %v246_v42 = vmul.f32 %v183_v40, %v183_v40 }
  0xde   :  { %v1743_v43 = vpop.f32.mrf.mxu0 }
  0xdf   :  { %280 = vrot.lane.b32.xlu1 %v245_v41, %s1996_s10  ;;  %282 = vrot.lane.b32.xlu0 %v246_v42, %s1996_s10  ;;  %v249_v49 = vmul.f32 %v1743_v43, %v1743_v43 }
  0xe0   :  { %v193_v44 = vpop.f32.mrf.mxu0 }
  0xe1   :  { %v248_v46 = vmul.f32 %v193_v44, %v193_v44 }
  0xe2   :  { %v1746_v47 = vpop.f32.mrf.mxu0 }
  0xe3   :  { %284 = vrot.lane.b32.xlu1 %v247_v45, %s1996_s10  ;;  %286 = vrot.lane.b32.xlu0 %v248_v46, %s1996_s10  ;;  %v251_v53 = vmul.f32 %v1746_v47, %v1746_v47 }
  0xe4   :  { %v203_v48 = vpop.f32.mrf.mxu0 }
  0xe5   :  { %v250_v50 = vmul.f32 %v203_v48, %v203_v48 }
  0xe6   :  { %v1749_v51 = vpop.f32.mrf.mxu0 }
  0xe7   :  { %288 = vrot.lane.b32.xlu1 %v249_v49, %s1996_s10  ;;  %290 = vrot.lane.b32.xlu0 %v250_v50, %s1996_s10  ;;  %v253_v57 = vmul.f32 %v1749_v51, %v1749_v51 }
  0xe8   :  { %v213_v52 = vpop.f32.mrf.mxu0 }
  0xe9   :  { %v252_v54 = vmul.f32 %v213_v52, %v213_v52 }
  0xea   :  { %v1752_v55 = vpop.f32.mrf.mxu0 }
  0xeb   :  { %292 = vrot.lane.b32.xlu1 %v251_v53, %s1996_s10  ;;  %294 = vrot.lane.b32.xlu0 %v252_v54, %s1996_s10  ;;  %v255_v61 = vmul.f32 %v1752_v55, %v1752_v55 }
  0xec   :  { %v223_v56 = vpop.f32.mrf.mxu0 }
  0xed   :  { %v254_v58 = vmul.f32 %v223_v56, %v223_v56 }
  0xee   :  { %v1755_v59 = vpop.f32.mrf.mxu0 }
  0xef   :  { %296 = vrot.lane.b32.xlu1 %v253_v57, %s1996_s10  ;;  %298 = vrot.lane.b32.xlu0 %v254_v58, %s1996_s10  ;;  %v257_v63 = vmul.f32 %v1755_v59, %v1755_v59 }
  0xf0   :  { %v233_v60 = vpop.f32.mrf.mxu0 }
  0xf1   :  { %v256_v62 = vmul.f32 %v233_v60, %v233_v60 }
  0xf3   :  { %300 = vrot.lane.b32.xlu1 %v255_v61, %s1996_s10  ;;  %302 = vrot.lane.b32.xlu0 %v256_v62, %s1996_s10 }
  0xf7   :  { %304 = vrot.lane.b32.xlu1 %v257_v63, %s1996_s10 }
 0x149   :  { %v275_v0 = vpop.permute.xlu0 %274 }
 0x14a   :  { %v322_v1 = vadd.f32 %v275_v0, %v242_v34 }
 0x14c   :  { %1772 = vmatprep.mubr.msk.f32.mxu1 %vm48_vm0, %v322_v1 }
 0x14d   :  { %v277_v2 = vpop.permute.xlu0 %276  ;;  %v279_v3 = vpop.permute.xlu1 %278 }
 0x14e   :  { %v323_v4 = vadd.f32 %v277_v2, %v243_v37  ;;  %v324_v5 = vadd.f32 %v279_v3, %v244_v38 }
 0x150   :  { %1773 = vmatmul.mubr.msk.f32.vlgmr.msra.gmra.mxu1 %vm48_vm0, %v323_v4 }
 0x151   :  { %1775 = vmatprep.mubr.msk.f32.mxu1 %vm48_vm0, %v324_v5  ;;  %v281_v6 = vpop.permute.xlu1 %280  ;;  %v283_v7 = vpop.permute.xlu0 %282 }
 0x152   :  { %v325_v8 = vadd.f32 %v281_v6, %v245_v41  ;;  %v326_v9 = vadd.f32 %v283_v7, %v246_v42 }
 0x154   :  { %1776 = vmatmul.mubr.msk.f32.gmra.mxu1 %vm48_vm0, %v325_v8 }
 0x155   :  { %v285_v10 = vpop.permute.xlu1 %284  ;;  %1778 = vmatprep.mubr.msk.f32.mxu1 %vm48_vm0, %v326_v9  ;;  %v287_v11 = vpop.permute.xlu0 %286 }
 0x156   :  { %v327_v12 = vadd.f32 %v285_v10, %v247_v45  ;;  %v328_v13 = vadd.f32 %v287_v11, %v248_v46 }
 0x158   :  { %1779 = vmatmul.mubr.msk.f32.gmra.mxu1 %vm48_vm0, %v327_v12 }
 0x159   :  { %v289_v14 = vpop.permute.xlu1 %288  ;;  %1781 = vmatprep.mubr.msk.f32.mxu1 %vm48_vm0, %v328_v13  ;;  %v291_v15 = vpop.permute.xlu0 %290 }
 0x15a   :  { %v329_v16 = vadd.f32 %v289_v14, %v249_v49  ;;  %v330_v17 = vadd.f32 %v291_v15, %v250_v50 }
 0x15c   :  { %1782 = vmatmul.mubr.msk.f32.gmra.mxu1 %vm48_vm0, %v329_v16 }
 0x15d   :  { %v293_v18 = vpop.permute.xlu1 %292  ;;  %1784 = vmatprep.mubr.msk.f32.mxu1 %vm48_vm0, %v330_v17  ;;  %v295_v19 = vpop.permute.xlu0 %294 }
 0x15e   :  { %v331_v20 = vadd.f32 %v293_v18, %v251_v53  ;;  %v332_v21 = vadd.f32 %v295_v19, %v252_v54 }
 0x160   :  { %1785 = vmatmul.mubr.msk.f32.gmra.mxu1 %vm48_vm0, %v331_v20 }
 0x161   :  { %v297_v22 = vpop.permute.xlu1 %296  ;;  %1787 = vmatprep.mubr.msk.f32.mxu1 %vm48_vm0, %v332_v21  ;;  %v299_v23 = vpop.permute.xlu0 %298 }
 0x162   :  { %v333_v24 = vadd.f32 %v297_v22, %v253_v57  ;;  %v334_v25 = vadd.f32 %v299_v23, %v254_v58 }
 0x164   :  { %1788 = vmatmul.mubr.msk.f32.gmra.mxu1 %vm48_vm0, %v333_v24 }
 0x165   :  { %v301_v26 = vpop.permute.xlu1 %300  ;;  %1790 = vmatprep.mubr.msk.f32.mxu1 %vm48_vm0, %v334_v25  ;;  %v303_v27 = vpop.permute.xlu0 %302 }
 0x166   :  { %v335_v28 = vadd.f32 %v301_v26, %v255_v61  ;;  %v336_v29 = vadd.f32 %v303_v27, %v256_v62 }
 0x168   :  { %1791 = vmatmul.mubr.msk.f32.gmra.mxu1 %vm48_vm0, %v335_v28 }
 0x169   :  { %v305_v30 = vpop.permute.xlu1 %304  ;;  %1793 = vmatprep.mubr.msk.f32.mxu1 %vm48_vm0, %v336_v29 }
 0x16a   :  { %v337_v31 = vadd.f32 %v305_v30, %v257_v63 }
 0x16c   :  { %1794 = vmatmul.mubr.msk.f32.gmra.mxu1 %vm48_vm0, %v337_v31 }
 0x210   :  { %v1774_v32 = vpop.f32.mrf.mxu1 }
 0x211   :  { %v540_v37 = vmax.f32 %v1774_v32, 1e-10 }
 0x212   :  { %v460_v33 = vpop.f32.mrf.mxu1 }
 0x213   :  { %v539_v39 = vmax.f32 %v460_v33, 1e-10  ;;  %1910 = vlog2.f32 %v540_v37 }
 0x214   :  { %v1777_v34 = vpop.f32.mrf.mxu1 }
 0x215   :  { %v542_v40 = vmax.f32 %v1777_v34, 1e-10  ;;  %1912 = vlog2.f32 %v539_v39 }
 0x216   :  { %v470_v35 = vpop.f32.mrf.mxu1 }
 0x217   :  { %1914 = vlog2.f32 %v542_v40  ;;  %v541_v48 = vmax.f32 %v470_v35, 1e-10 }
 0x218   :  { %v1780_v36 = vpop.f32.mrf.mxu1 }
 0x219   :  { %v544_v42 = vmax.f32 %v1780_v36, 1e-10 }
 0x21a   :  { %v480_v38 = vpop.f32.mrf.mxu1 }
 0x21b   :  { %v543_v43 = vmax.f32 %v480_v38, 1e-10  ;;  %1916 = vlog2.f32 %v544_v42 }
 0x21c   :  { %v1783_v41 = vpop.f32.mrf.mxu1 }
 0x21d   :  { %v546_v45 = vmax.f32 %v1783_v41, 1e-10  ;;  %1918 = vlog2.f32 %v543_v43 }
 0x21e   :  { %v490_v44 = vpop.f32.mrf.mxu1 }
 0x21f   :  { %v545_v46 = vmax.f32 %v490_v44, 1e-10  ;;  %1920 = vlog2.f32 %v546_v45 }
 0x220   :  { %v1786_v47 = vpop.f32.mrf.mxu1  ;;  %v1911_v59 = vpop.eup %1910 }
 0x221   :  { %v548_v50 = vmax.f32 %v1786_v47, 1e-10  ;;  %1922 = vlog2.f32 %v545_v46  ;;  %v558_v8 = vmul.f32 0.6931472, %v1911_v59 }
 0x222   :  { %v500_v49 = vpop.f32.mrf.mxu1  ;;  %v1913_v60 = vpop.eup %1912 }
 0x223   :  { %v547_v51 = vmax.f32 %v500_v49, 1e-10  ;;  %v556_v9 = vmul.f32 0.6931472, %v1913_v60  ;;  %v2179_v19 = vmul.f32 0.4342945, %v558_v8 }
 0x224   :  { %v1789_v52 = vpop.f32.mrf.mxu1  ;;  %v1915_v63 = vpop.eup %1914 }
 0x225   :  { %1924 = vlog2.f32 %v547_v51  ;;  %v550_v53 = vmax.f32 %v1789_v52, 1e-10  ;;  %v562_v10 = vmul.f32 0.6931472, %v1915_v63  ;;  %v2181_v20 = vmul.f32 0.4342945, %v556_v9 }
 0x226   :  { %1926 = vlog2.f32 %v541_v48  ;;  %v510_v54 = vpop.f32.mrf.mxu1  ;;  %v605_v33 = vsel %vm603_vm1, %v2179_v19, -inf }
 0x227   :  { %1928 = vlog2.f32 %v548_v50  ;;  %v549_v55 = vmax.f32 %v510_v54, 1e-10  ;;  %v2183_v21 = vmul.f32 0.4342945, %v562_v10  ;;  %v604_v34 = vsel %vm603_vm1, %v2181_v20, -inf }
 0x228   :  { %1930 = vlog2.f32 %v550_v53  ;;  %v1792_v56 = vpop.f32.mrf.mxu1  ;;  %v1917_v0 = vpop.eup %1916 }
 0x229   :  { %1932 = vlog2.f32 %v549_v55  ;;  %v552_v57 = vmax.f32 %v1792_v56, 1e-10  ;;  %v566_v13 = vmul.f32 0.6931472, %v1917_v0  ;;  %v607_v40 = vsel %vm603_vm1, %v2183_v21, -inf }
 0x22a   :  { %v520_v58 = vpop.f32.mrf.mxu1  ;;  %v1919_v3 = vpop.eup %1918 }
 0x22b   :  { %1934 = vlog2.f32 %v552_v57  ;;  %v551_v61 = vmax.f32 %v520_v58, 1e-10  ;;  %v564_v14 = vmul.f32 0.6931472, %v1919_v3  ;;  %v2185_v26 = vmul.f32 0.4342945, %v566_v13 }
 0x22c   :  { %v1795_v62 = vpop.f32.mrf.mxu1  ;;  %v1921_v4 = vpop.eup %1920 }
 0x22d   :  { %1936 = vlog2.f32 %v551_v61  ;;  %v554_v1 = vmax.f32 %v1795_v62, 1e-10  ;;  %v570_v16 = vmul.f32 0.6931472, %v1921_v4  ;;  %v2187_v27 = vmul.f32 0.4342945, %v564_v14 }
 0x22e   :  { %v530_v2 = vpop.f32.mrf.mxu1  ;;  %v1923_v6 = vpop.eup %1922  ;;  %v610_v45 = vsel %vm603_vm1, %v2185_v26, -inf }
 0x22f   :  { %1938 = vlog2.f32 %v554_v1  ;;  %v553_v5 = vmax.f32 %v530_v2, 1e-10  ;;  %v568_v17 = vmul.f32 0.6931472, %v1923_v6  ;;  %v594_v30 = vmul.f32 0.4342945, %v570_v16 }
 0x230   :  { %v608_v41 = vsel %vm603_vm1, %v2187_v27, -inf  ;;  %v611_v61 = vmax.f32 %v605_v33, %v610_v45  ;;  %v2241_v16 = vld [vmem:[%s2436_s4] sm:$0xff] }
 0x231   :  { %1940 = vlog2.f32 %v553_v5  ;;  %v593_v31 = vmul.f32 0.4342945, %v568_v17  ;;  %v614_v46 = vsel %vm603_vm1, %v594_v30, -inf  ;;  %v609_v54 = vmax.f32 %v604_v34, %v608_v41 }
 0x232   :  { %v1925_v7 = vpop.eup %1924  ;;  %v615_v62 = vmax.f32 %v607_v40, %v614_v46 }
 0x233   :  { %v1927_v11 = vpop.eup %1926  ;;  %v572_v18 = vmul.f32 0.6931472, %v1925_v7  ;;  %v612_v47 = vsel %vm603_vm1, %v593_v31, -inf }
 0x234   :  { %v1929_v12 = vpop.eup %1928  ;;  %v560_v23 = vmul.f32 0.6931472, %v1927_v11 }
 0x235   :  { %v1931_v15 = vpop.eup %1930  ;;  %v574_v24 = vmul.f32 0.6931472, %v1929_v12  ;;  %v2189_v32 = vmul.f32 0.4342945, %v572_v18 }
 0x236   :  { %v1933_v22 = vpop.eup %1932  ;;  %v578_v25 = vmul.f32 0.6931472, %v1931_v15  ;;  %v2195_v37 = vmul.f32 0.4342945, %v560_v23  ;;  %v2234_v15 = vld [vmem:[%s2436_s4 + $0x8] sm:$0xff] }
 0x237   :  { %v576_v28 = vmul.f32 0.6931472, %v1933_v22  ;;  %v2197_v38 = vmul.f32 0.4342945, %v574_v24  ;;  %v616_v48 = vsel %vm603_vm1, %v2189_v32, -inf  ;;  %1796 = vmatprep.subr.mxu0 %v2234_v15 }
 0x238   :  { %v1935_v29 = vpop.eup %1934  ;;  %v2199_v39 = vmul.f32 0.4342945, %v578_v25  ;;  %v606_v53 = vsel %vm603_vm1, %v2195_v37, -inf  ;;  %v617_v0 = vmax.f32 %v609_v54, %v616_v48  ;;  %1797 = vmatpush3.msra.mxu0 %v2234_v15 }
 0x239   :  { %v582_v35 = vmul.f32 0.6931472, %v1935_v29  ;;  %v2205_v42 = vmul.f32 0.4342945, %v576_v28  ;;  %v618_v55 = vsel %vm603_vm1, %v2197_v38, -inf  ;;  %v613_v63 = vmax.f32 %v606_v53, %v612_v47  ;;  %1798 = vmatprep.subr.mxu0 %v2241_v16 }
 0x23a   :  { %v1937_v36 = vpop.eup %1936  ;;  %v622_v56 = vsel %vm603_vm1, %v2199_v39, -inf  ;;  %v619_v4 = vmax.f32 %v611_v61, %v618_v55  ;;  %1799 = vmatpush3.msra.mxu0 %v2241_v16 }
 0x23b   :  { %v580_v43 = vmul.f32 0.6931472, %v1937_v36  ;;  %v2213_v49 = vmul.f32 0.4342945, %v582_v35  ;;  %v620_v57 = vsel %vm603_vm1, %v2205_v42, -inf  ;;  %v623_v6 = vmax.f32 %v615_v62, %v622_v56 }
 0x23c   :  { %v1939_v44 = vpop.eup %1938  ;;  %v621_v5 = vmax.f32 %v613_v63, %v620_v57 }
 0x23d   :  { %v2215_v50 = vmul.f32 0.4342945, %v580_v43  ;;  %v586_v51 = vmul.f32 0.6931472, %v1939_v44  ;;  %v626_v2 = vsel %vm603_vm1, %v2213_v49, -inf }
 0x23e   :  { %v1941_v52 = vpop.eup %1940  ;;  %v627_v9 = vmax.f32 %v619_v4, %v626_v2 }
 0x23f   :  { %v602_v58 = vmul.f32 0.4342945, %v586_v51  ;;  %v584_v59 = vmul.f32 0.6931472, %v1941_v52  ;;  %v624_v60 = vsel %vm603_vm1, %v2215_v50, -inf  ;;  %v1997_v51 = vmov 0.0  }
 0x240   :  { %v625_v7 = vmax.f32 %v617_v0, %v624_v60  ;;  %1809 = vmatprep.subr.mxu1 %v1997_v51  ;;  %1824 = vmatprep.subr.mxu0 %v1997_v51 }
 0x241   :  { %v601_v1 = vmul.f32 0.4342945, %v584_v59  ;;  %v630_v3 = vsel %vm603_vm1, %v602_v58, -inf  ;;  %1821 = vmatprep.mubr.msk.f32.mxu1 %vm1998_vm2, %v1997_v51 }
 0x242   :  { %v631_v11 = vmax.f32 %v623_v6, %v630_v3  ;;  %v632_v12 = vmax.f32 %v625_v7, %v627_v9 }
 0x243   :  { %v628_v8 = vsel %vm603_vm1, %v601_v1, -inf }
 0x244   :  { %v629_v10 = vmax.f32 %v621_v5, %v628_v8 }
 0x246   :  { %v633_v13 = vmax.f32 %v629_v10, %v631_v11 }
 0x248   :  { %v634_v14 = vmax.f32 %v632_v12, %v633_v13 }
 0x24a   :  { %635 = vmax.xlane.f32.xlu0 %v634_v14 }
 0x2d3   :  { %v636_v17 = vpop.xlane.xlu0 %635 }
 0x2d4   :  { %v637_v18 = vrot.slane %v636_v17, 4 }
 0x2d6   :  { %v638_v22 = vmax.f32 %v636_v17, %v637_v18 }
 0x2d8   :  { %v639_v23 = vrot.slane %v638_v22, 2 }
 0x2da   :  { %v640_v24 = vmax.f32 %v638_v22, %v639_v23 }
 0x2dc   :  { %v641_v25 = vrot.slane %v640_v24, 1 }
 0x2de   :  { %v642_v28 = vmax.f32 %v640_v24, %v641_v25 }
 0x2e0   :  { %1904 = vpush %v642_v28 }
 0x311   :  { %s1905_s14 = spop %1904 }
 0x312   :  { %v644_v29 = vstv %s1905_s14 }
 0x313   :  { %v2245_v30 = vadd.f32 -8.0, %v644_v29 }
 0x315   :  { %v646_v31 = vmax.f32 %v2181_v20, %v2245_v30  ;;  %v647_v33 = vmax.f32 %v2179_v19, %v2245_v30  ;;  %v648_v34 = vmax.f32 %v2195_v37, %v2245_v30  ;;  %v649_v35 = vmax.f32 %v2183_v21, %v2245_v30 }
 0x316   :  { %v650_v43 = vmax.f32 %v2187_v27, %v2245_v30  ;;  %v651_v20 = vmax.f32 %v2185_v26, %v2245_v30 }
 0x317   :  { %v658_v36 = vadd.f32 4.0, %v646_v31  ;;  %v659_v40 = vadd.f32 4.0, %v647_v33  ;;  %v660_v41 = vadd.f32 4.0, %v648_v34  ;;  %v661_v46 = vadd.f32 4.0, %v649_v35 }
 0x318   :  { %v662_v47 = vadd.f32 4.0, %v650_v43  ;;  %v663_v37 = vadd.f32 4.0, %v651_v20 }
 0x319   :  { %v671_v44 = vmul.f32 0.25, %v658_v36  ;;  %v672_v45 = vmul.f32 0.25, %v659_v40  ;;  %v673_v19 = vmul.f32 0.25, %v660_v41  ;;  %v674_v21 = vmul.f32 0.25, %v661_v46 }
 0x31a   :  { %v675_v48 = vmul.f32 0.25, %v662_v47  ;;  %v676_v27 = vmul.f32 0.25, %v663_v37 }
 0x31b   :  { %1800 = vmatprep.mubr.msk.f32.mxu0 %vm603_vm1, %v671_v44 }
 0x31c   :  { %1801 = vmatmul.mubr.msk.f32.vlgmr.msra.gmra.mxu0 %vm603_vm1, %v672_v45 }
 0x31d   :  { %1803 = vmatprep.mubr.msk.f32.mxu0 %vm603_vm1, %v673_v19 }
 0x320   :  { %1804 = vmatmul.mubr.msk.f32.gmra.mxu0 %vm603_vm1, %v674_v21 }
 0x321   :  { %1806 = vmatprep.mubr.msk.f32.mxu0 %vm603_vm1, %v675_v48 }
 0x324   :  { %1807 = vmatmul.mubr.msk.f32.gmra.mxu0 %vm603_vm1, %v676_v27 }
 0x325   :  { %1836 = vmatprep.mubr.msk.f32.mxu0 %vm1998_vm2, %v1997_v51 }
 0x3dc   :  { %v2271_v26 = vpop.f32.mrf.mxu0 }
 0x3dd   :  { %v804_v52 = vmul.f32 %v2271_v26, %v2271_v26 }
 0x3de   :  { %v2275_v53 = vpop.f32.mrf.mxu0 }
 0x3df   :  { %v803_v54 = vmul.f32 %v2275_v53, %v2275_v53  ;;  %v810_v56 = vmul.f32 %v2271_v26, %v804_v52 }
 0x3e0   :  { %v1805_v55 = vpop.f32.mrf.mxu0 }
 0x3e1   :  { %v806_v57 = vmul.f32 %v1805_v55, %v1805_v55  ;;  %v809_v61 = vmul.f32 %v803_v54, %v2275_v53  ;;  %v816_v63 = vmul.f32 0.044715, %v810_v56 }
 0x3e2   :  { %v2280_v58 = vpop.f32.mrf.mxu0 }
 0x3e3   :  { %v812_v59 = vmul.f32 %v1805_v55, %v806_v57  ;;  %v805_v60 = vmul.f32 %v2280_v58, %v2280_v58  ;;  %v815_v6 = vmul.f32 0.044715, %v809_v61  ;;  %v822_v9 = vadd.f32 %v2271_v26, %v816_v63 }
 0x3e4   :  { %v1808_v62 = vpop.f32.mrf.mxu0 }
 0x3e5   :  { %v818_v0 = vmul.f32 0.044715, %v812_v59  ;;  %v811_v1 = vmul.f32 %v805_v60, %v2280_v58  ;;  %v808_v2 = vmul.f32 %v1808_v62, %v1808_v62  ;;  %v821_v17 = vadd.f32 %v815_v6, %v2275_v53 }
 0x3e6   :  { %v794_v3 = vpop.f32.mrf.mxu0  ;;  %v828_v23 = vmul.f32 0.7978846, %v822_v9  ;;  %v2348_v9 = vld [vmem:[%s2437_s5] sm:$0xff] }
 0x3e7   :  { %v824_v4 = vadd.f32 %v1805_v55, %v818_v0  ;;  %v817_v5 = vmul.f32 0.044715, %v811_v1  ;;  %v814_v7 = vmul.f32 %v1808_v62, %v808_v2  ;;  %v807_v8 = vmul.f32 %v794_v3, %v794_v3 }
 0x3e8   :  { %v827_v28 = vmul.f32 0.7978846, %v821_v17 }
 0x3e9   :  { %v823_v10 = vadd.f32 %v817_v5, %v2280_v58  ;;  %v830_v11 = vmul.f32 0.7978846, %v824_v4  ;;  %v820_v12 = vmul.f32 0.044715, %v814_v7  ;;  %v813_v13 = vmul.f32 %v807_v8, %v794_v3  ;;  %v2329_v4 = vld [vmem:[%s2437_s5 + $0x10] sm:$0xff]  ;;  %v2341_v8 = vld [vmem:[%s2437_s5 + $0x8] sm:$0xff] }
 0x3eb   :  { %v829_v14 = vmul.f32 0.7978846, %v823_v10  ;;  %v826_v18 = vadd.f32 %v1808_v62, %v820_v12  ;;  %v819_v22 = vmul.f32 0.044715, %v813_v13  ;;  %1942 = vtanh.f32 %v830_v11 }
 0x3ec   :  { %v652_v10 = vmax.f32 %v2189_v32, %v2245_v30  ;;  %v653_v11 = vmax.f32 %v2197_v38, %v2245_v30  ;;  %v654_v13 = vmax.f32 %v2205_v42, %v2245_v30  ;;  %v656_v32 = vmax.f32 %v2215_v50, %v2245_v30 }
 0x3ed   :  { %v832_v24 = vmul.f32 0.7978846, %v826_v18  ;;  %v825_v25 = vadd.f32 %v819_v22, %v794_v3  ;;  %1944 = vtanh.f32 %v829_v14  ;;  %v655_v22 = vmax.f32 %v2199_v39, %v2245_v30 }
 0x3ee   :  { %v664_v12 = vadd.f32 4.0, %v652_v10  ;;  %v665_v18 = vadd.f32 4.0, %v653_v11 }
 0x3ef   :  { %1946 = vtanh.f32 %v832_v24  ;;  %v831_v29 = vmul.f32 0.7978846, %v825_v25  ;;  %v666_v25 = vadd.f32 4.0, %v654_v13  ;;  %v667_v42 = vadd.f32 4.0, %v655_v22 }
 0x3f0   :  { %1948 = vtanh.f32 %v828_v23  ;;  %v677_v24 = vmul.f32 0.25, %v664_v12  ;;  %v678_v38 = vmul.f32 0.25, %v665_v18 }
 0x3f1   :  { %1950 = vtanh.f32 %v831_v29  ;;  %v679_v39 = vmul.f32 0.25, %v666_v25  ;;  %v668_v29 = vadd.f32 4.0, %v656_v32  ;;  %v680_v50 = vmul.f32 0.25, %v667_v42 }
 0x3f2   :  { %1952 = vtanh.f32 %v827_v28  ;;  %v657_v28 = vmax.f32 %v2213_v49, %v2245_v30 }
 0x3f8   :  { %v1943_v31 = vpop.eup %1942 }
 0x3f9   :  { %v842_v36 = vadd.f32 1.0, %v1943_v31  ;;  %v681_v31 = vmul.f32 0.25, %v668_v29 }
 0x3fa   :  { %v1945_v33 = vpop.eup %1944 }
 0x3fb   :  { %v841_v43 = vadd.f32 1.0, %v1945_v33  ;;  %v848_v19 = vmul.f32 0.5, %v842_v36 }
 0x3fc   :  { %v1947_v34 = vpop.eup %1946 }
 0x3fd   :  { %v1949_v35 = vpop.eup %1948  ;;  %v844_v40 = vadd.f32 1.0, %v1947_v34  ;;  %v847_v48 = vmul.f32 0.5, %v841_v43  ;;  %v854_v54 = vmul.f32 %v1805_v55, %v848_v19 }
 0x3fe   :  { %v1951_v41 = vpop.eup %1950  ;;  %v840_v20 = vadd.f32 1.0, %v1949_v35 }
 0x3ff   :  { %v850_v44 = vmul.f32 0.5, %v844_v40  ;;  %v843_v45 = vadd.f32 1.0, %v1951_v41  ;;  %v1953_v46 = vpop.eup %1952  ;;  %v853_v57 = vmul.f32 %v847_v48, %v2280_v58 }
 0x400   :  { %v839_v37 = vadd.f32 1.0, %v1953_v46  ;;  %v846_v52 = vmul.f32 0.5, %v840_v20 }
 0x401   :  { %v856_v47 = vmul.f32 %v1808_v62, %v850_v44  ;;  %v849_v21 = vmul.f32 0.5, %v843_v45 }
 0x402   :  { %v845_v56 = vmul.f32 0.5, %v839_v37  ;;  %v852_v59 = vmul.f32 %v2271_v26, %v846_v52  ;;  %v2312_v26 = vld [vmem:[%s2435_s3] sm:$0xff] }
 0x403   :  { %v855_v27 = vmul.f32 %v849_v21, %v794_v3  ;;  %1810 = vmatpush3.xpose.msk.msra.mxu1 %vm857_vm3, %v856_v47  ;;  %1825 = vmatpush3.msra.mxu0 %v856_v47  ;;  %v2324_v3 = vld [vmem:[%s2437_s5 + $0x18] sm:$0xff]  ;;  %s1999_s5 = smov [#allocation2]  }
 0x404   :  { %1826 = vmatprep.subr.mxu0 %v1997_v51  ;;  %1811 = vmatprep.subr.mxu1 %v1997_v51  ;;  %v851_v55 = vmul.f32 %v845_v56, %v2275_v53  ;;  %s1543_s22 = sshll.u32 %s1999_s5, 4  ;;  %s1544_s22 = int_to_ptr.vmem [resolvable:$true] %s1543_s22 }
 0x405   :  { %1827 = vmatpush3.msra.mxu0 %v855_v27  ;;  %s1974_s23 = scalar_lea.vmem %s1544_s22, 128  ;;  %p1979_p1 = scmp.lt.s32.totalorder %s1544_s22, %s1544_s22 }
 0x406   :  { %1828 = vmatprep.subr.mxu0 %v1997_v51  ;;  %p1975_p0 = scmp.ne.s32.totalorder %s1544_s22, %s1974_s23  ;;  %p1980_p2 = scmp.lt.s32.totalorder %s1974_s23, %s1974_s23 }
 0x407   :  { %1812 = vmatpush3.xpose.msk.msra.mxu1 %vm857_vm3, %v855_v27  ;;  %1829 = vmatpush3.msra.mxu0 %v854_v54 }
 0x408   :  { %1830 = vmatprep.subr.mxu0 %v1997_v51  ;;  %1813 = vmatprep.subr.mxu1 %v1997_v51  ;;  %p1981_p3 = por %p1980_p2, %p1979_p1 }
 0x409   :  { %1831 = vmatpush3.msra.mxu0 %v853_v57 }
 0x40a   :  { %1832 = vmatprep.subr.mxu0 %v1997_v51  ;;  %p1982_p4 = pnand %p1981_p3, %p1975_p0 }
 0x40b   :  { %1814 = vmatpush3.xpose.msk.msra.mxu1 %vm857_vm3, %v854_v54  ;;  %1833 = vmatpush3.msra.mxu0 %v852_v59 }
 0x40c   :  { %1834 = vmatprep.subr.mxu0 %v1997_v51  ;;  %1815 = vmatprep.subr.mxu1 %v1997_v51 }
 0x40d   :  { %1835 = vmatpush3.msra.mxu0 %v851_v55 }
 0x40e   :  { %1863 = vmatprep.subr.mxu0 %v1997_v51 }
 0x40f   :  { %1816 = vmatpush3.xpose.msk.msra.mxu1 %vm857_vm3, %v853_v57 }
 0x410   :  { %1817 = vmatprep.subr.mxu1 %v1997_v51 }
 0x413   :  { %1818 = vmatpush3.xpose.msk.msra.mxu1 %vm857_vm3, %v852_v59 }
 0x414   :  { %1819 = vmatprep.subr.mxu1 %v1997_v51 }
 0x417   :  { %1820 = vmatpush3.xpose.msk.msra.mxu1 %vm857_vm3, %v851_v55 }
 0x418   :  { %1839 = vmatprep.subr.mxu1 %v1997_v51 }
 0x41a   :  { %1822 = vmatmul.mubr.msk.f32.vlgmr.msra.gmra.mxu1 %vm857_vm3, %v2312_v26 }
 0x41b   :  { %1847 = vmatprep.mubr.msk.f32.mxu1 %vm1998_vm2, %v1997_v51  ;;  %1840 = vmatpush3.msra.mxu1 %v2324_v3 }
 0x41c   :  { %1841 = vmatprep.subr.mxu1 %v1997_v51 }
 0x41d   :  { %1842 = vmatpush3.msra.mxu1 %v2329_v4 }
 0x41e   :  { %1843 = vmatprep.subr.mxu1 %v1997_v51 }
 0x41f   :  { %1844 = vmatpush3.msra.mxu1 %v2341_v8 }
 0x420   :  { %1845 = vmatprep.subr.mxu1 %v1997_v51 }
 0x421   :  { %1846 = vmatpush3.msra.mxu1 %v2348_v9 }
 0x422   :  { %1850 = vmatprep.subr.mxu1 %v2234_v15 }
 0x4da   :  { %v945_v53 = vpop.f32.mrf.mxu1 }
 0x4db   :  { %v949_v58 = vmul.f32 0.17677669, %v945_v53 }
 0x4dc   :  { %v1823_v60 = vpop.f32.mrf.mxu1 }
 0x4dd   :  { %v951_v61 = vsel %vm950_vm4, %v949_v58, -inf }
 0x4de   :  { %952 = vmax.xlane.f32.xlu1 %v951_v61 }
 0x567   :  { %v953_v62 = vpop.xlane.xlu1 %952 }
 0x568   :  { %v954_v63 = vsub.f32 %v949_v58, %v953_v62 }
 0x56a   :  { %v955_v0 = vmul.f32 1.442695, %v954_v63 }
 0x56c   :  { %1954 = vpow2.f32 %v955_v0 }
 0x579   :  { %v1955_v1 = vpop.eup %1954 }
 0x57a   :  { %v957_v2 = vsel %vm950_vm4, %v1955_v1, 0.0 }
 0x57b   :  { %958 = vadd.xlane.f32.xlu0 %v957_v2 }
 0x604   :  { %v959_v5 = vpop.xlane.xlu0 %958 }
 0x605   :  { %1956 = vrcp.f32 %v959_v5 }
 0x612   :  { %v1957_v6 = vpop.eup %1956 }
 0x613   :  { %v961_v7 = vmul.f32 %v1957_v6, %v1955_v1 }
 0x615   :  { %1837 = vmatmul.mubr.msk.f32.vlgmr.msra.gmra.mxu0 %vm962_vm5, %v961_v7 }
 0x616   :  { %1875 = vmatprep.mubr.msk.f32.mxu0 %vm1998_vm2, %v1997_v51 }
 0x6d5   :  { %v1032_v14 = vpop.f32.mrf.mxu0 }
 0x6d6   :  { %v1036_v17 = vadd.f32 %v1032_v14, %v2312_v26 }
 0x6d7   :  { %v1838_v23 = vpop.f32.mrf.mxu0 }
 0x6d8   :  { %1848 = vmatmul.mubr.msk.f32.vlgmr.msra.gmra.mxu1 %vm857_vm3, %v1036_v17 }
 0x6d9   :  { %1851 = vmatpush3.msra.mxu1 %v2234_v15  ;;  %1854 = vmatprep.mubr.msk.f32.mxu1 %vm603_vm1, %v677_v24  ;;  %v669_v15 = vadd.f32 4.0, %v657_v28 }
 0x6da   :  { %1852 = vmatprep.subr.mxu1 %v2241_v16 }
 0x6db   :  { %1853 = vmatpush3.msra.mxu1 %v2241_v16  ;;  %v682_v33 = vmul.f32 0.25, %v669_v15 }
 0x6dc   :  { %1855 = vmatmul.mubr.msk.f32.vlgmr.msra.gmra.mxu1 %vm603_vm1, %v678_v38  ;;  %1878 = vmatprep.subr.mxu1 %v1997_v51 }
 0x6dd   :  { %1857 = vmatprep.mubr.msk.f32.mxu1 %vm603_vm1, %v679_v39 }
 0x6e0   :  { %1858 = vmatmul.mubr.msk.f32.gmra.mxu1 %vm603_vm1, %v680_v50 }
 0x6e1   :  { %1860 = vmatprep.mubr.msk.f32.mxu1 %vm603_vm1, %v681_v31 }
 0x6e4   :  { %1861 = vmatmul.mubr.msk.f32.gmra.mxu1 %vm603_vm1, %v682_v33 }
 0x6e5   :  { %1890 = vmatprep.mubr.msk.f32.mxu1 %vm1998_vm2, %v1997_v51 }
 0x798   :  { %v2378_v49 = vpop.f32.mrf.mxu1 }
 0x79a   :  { %v1849_v16 = vpop.f32.mrf.mxu1 }
 0x79c   :  { %v2380_v30 = vpop.f32.mrf.mxu1 }
 0x79d   :  { %v1224_v34 = vmul.f32 %v2380_v30, %v2380_v30 }
 0x79e   :  { %v2384_v35 = vpop.f32.mrf.mxu1 }
 0x79f   :  { %v1223_v36 = vmul.f32 %v2384_v35, %v2384_v35  ;;  %v1230_v41 = vmul.f32 %v2380_v30, %v1224_v34 }
 0x7a0   :  { %v1859_v40 = vpop.f32.mrf.mxu1 }
 0x7a1   :  { %v1226_v43 = vmul.f32 %v1859_v40, %v1859_v40  ;;  %v1229_v20 = vmul.f32 %v1223_v36, %v2384_v35  ;;  %v1236_v47 = vmul.f32 0.044715, %v1230_v41 }
 0x7a2   :  { %v1204_v44 = vpop.f32.mrf.mxu1 }
 0x7a3   :  { %v1232_v45 = vmul.f32 %v1859_v40, %v1226_v43  ;;  %v1225_v46 = vmul.f32 %v1204_v44, %v1204_v44  ;;  %v1235_v56 = vmul.f32 0.044715, %v1229_v20  ;;  %v1242_v55 = vadd.f32 %v2380_v30, %v1236_v47 }
 0x7a4   :  { %v1862_v19 = vpop.f32.mrf.mxu1 }
 0x7a5   :  { %v1238_v21 = vmul.f32 0.044715, %v1232_v45  ;;  %v1231_v37 = vmul.f32 %v1225_v46, %v1204_v44  ;;  %v1228_v48 = vmul.f32 %v1862_v19, %v1862_v19  ;;  %v1241_v63 = vadd.f32 %v1235_v56, %v2384_v35 }
 0x7a6   :  { %v1214_v27 = vpop.f32.mrf.mxu1  ;;  %v1248_v2 = vmul.f32 0.7978846, %v1242_v55 }
 0x7a7   :  { %v1244_v52 = vadd.f32 %v1859_v40, %v1238_v21  ;;  %v1237_v54 = vmul.f32 0.044715, %v1231_v37  ;;  %v1234_v57 = vmul.f32 %v1862_v19, %v1228_v48  ;;  %v1227_v59 = vmul.f32 %v1214_v27, %v1214_v27 }
 0x7a8   :  { %v1247_v7 = vmul.f32 0.7978846, %v1241_v63 }
 0x7a9   :  { %v1243_v53 = vadd.f32 %v1237_v54, %v1204_v44  ;;  %v1250_v58 = vmul.f32 0.7978846, %v1244_v52  ;;  %v1240_v60 = vmul.f32 0.044715, %v1234_v57  ;;  %v1233_v61 = vmul.f32 %v1227_v59, %v1214_v27 }
 0x7ab   :  { %v1249_v62 = vmul.f32 0.7978846, %v1243_v53  ;;  %v1246_v0 = vadd.f32 %v1862_v19, %v1240_v60  ;;  %v1239_v1 = vmul.f32 0.044715, %v1233_v61  ;;  %1958 = vtanh.f32 %v1250_v58 }
 0x7ad   :  { %v1252_v5 = vmul.f32 0.7978846, %v1246_v0  ;;  %v1245_v6 = vadd.f32 %v1239_v1, %v1214_v27  ;;  %1960 = vtanh.f32 %v1249_v62 }
 0x7af   :  { %1962 = vtanh.f32 %v1252_v5  ;;  %v1251_v10 = vmul.f32 0.7978846, %v1245_v6 }
 0x7b0   :  { %1964 = vtanh.f32 %v1248_v2 }
 0x7b1   :  { %1966 = vtanh.f32 %v1251_v10 }
 0x7b2   :  { %1968 = vtanh.f32 %v1247_v7 }
 0x7b8   :  { %v1959_v11 = vpop.eup %1958 }
 0x7b9   :  { %v1262_v17 = vadd.f32 1.0, %v1959_v11 }
 0x7ba   :  { %v1961_v12 = vpop.eup %1960 }
 0x7bb   :  { %v1261_v23 = vadd.f32 1.0, %v1961_v12  ;;  %v1268_v42 = vmul.f32 0.5, %v1262_v17 }
 0x7bc   :  { %v1963_v13 = vpop.eup %1962 }
 0x7bd   :  { %v1965_v14 = vpop.eup %1964  ;;  %v1264_v18 = vadd.f32 1.0, %v1963_v13  ;;  %v1267_v50 = vmul.f32 0.5, %v1261_v23  ;;  %v1274_v33 = vmul.f32 %v1859_v40, %v1268_v42 }
 0x7be   :  { %v1967_v22 = vpop.eup %1966  ;;  %v1260_v38 = vadd.f32 1.0, %v1965_v14 }
 0x7bf   :  { %v1270_v24 = vmul.f32 0.5, %v1264_v18  ;;  %v1263_v25 = vadd.f32 1.0, %v1967_v22  ;;  %v1969_v32 = vpop.eup %1968  ;;  %v1273_v34 = vmul.f32 %v1267_v50, %v1204_v44 }
 0x7c0   :  { %v1259_v29 = vadd.f32 1.0, %v1969_v32  ;;  %v1266_v31 = vmul.f32 0.5, %v1260_v38 }
 0x7c1   :  { %v1276_v28 = vmul.f32 %v1862_v19, %v1270_v24  ;;  %v1269_v39 = vmul.f32 0.5, %v1263_v25 }
 0x7c2   :  { %v1265_v16 = vmul.f32 0.5, %v1259_v29  ;;  %v1272_v36 = vmul.f32 %v2380_v30, %v1266_v31  ;;  %v1277_v30 = vrot.slane %v2312_v26, 4 }
 0x7c3   :  { %v1275_v15 = vmul.f32 %v1269_v39, %v1214_v27  ;;  %1864 = vmatpush3.xpose.msk.msra.mxu0 %vm857_vm3, %v1276_v28  ;;  %1879 = vmatpush3.msra.mxu1 %v1276_v28 }
 0x7c4   :  { %1880 = vmatprep.subr.mxu1 %v1997_v51  ;;  %1865 = vmatprep.subr.mxu0 %v1997_v51  ;;  %v1271_v41 = vmul.f32 %v1265_v16, %v2384_v35 }
 0x7c5   :  { %1881 = vmatpush3.msra.mxu1 %v1275_v15 }
 0x7c6   :  { %1882 = vmatprep.subr.mxu1 %v1997_v51 }
 0x7c7   :  { %1866 = vmatpush3.xpose.msk.msra.mxu0 %vm857_vm3, %v1275_v15  ;;  %1883 = vmatpush3.msra.mxu1 %v1274_v33 }
 0x7c8   :  { %1884 = vmatprep.subr.mxu1 %v1997_v51  ;;  %1867 = vmatprep.subr.mxu0 %v1997_v51 }
 0x7c9   :  { %1885 = vmatpush3.msra.mxu1 %v1273_v34 }
 0x7ca   :  { %1886 = vmatprep.subr.mxu1 %v1997_v51 }
 0x7cb   :  { %1868 = vmatpush3.xpose.msk.msra.mxu0 %vm857_vm3, %v1274_v33  ;;  %1887 = vmatpush3.msra.mxu1 %v1272_v36 }
 0x7cc   :  { %1888 = vmatprep.subr.mxu1 %v1997_v51  ;;  %1869 = vmatprep.subr.mxu0 %v1997_v51 }
 0x7cd   :  { %1889 = vmatpush3.msra.mxu1 %v1271_v41 }
 0x7ce   :  { %1893 = vmatprep.subr.mxu1 %v1997_v51 }
 0x7cf   :  { %1870 = vmatpush3.xpose.msk.msra.mxu0 %vm857_vm3, %v1273_v34 }
 0x7d0   :  { %1871 = vmatprep.subr.mxu0 %v1997_v51 }
 0x7d3   :  { %1872 = vmatpush3.xpose.msk.msra.mxu0 %vm857_vm3, %v1272_v36 }
 0x7d4   :  { %1873 = vmatprep.subr.mxu0 %v1997_v51 }
 0x7d7   :  { %1874 = vmatpush3.xpose.msk.msra.mxu0 %vm857_vm3, %v1271_v41 }
 0x7da   :  { %1876 = vmatmul.mubr.msk.f32.vlgmr.msra.gmra.mxu0 %vm857_vm3, %v1277_v30 }
 0x89a   :  { %v1364_v35 = vpop.f32.mrf.mxu0 }
 0x89b   :  { %v1368_v40 = vmul.f32 0.17677669, %v1364_v35 }
 0x89c   :  { %v1877_v43 = vpop.f32.mrf.mxu0 }
 0x89d   :  { %v1369_v44 = vsel %vm950_vm4, %v1368_v40, -inf }
 0x89e   :  { %1370 = vmax.xlane.f32.xlu0 %v1369_v44 }
 0x927   :  { %v1371_v45 = vpop.xlane.xlu0 %1370 }
 0x928   :  { %v1372_v46 = vsub.f32 %v1368_v40, %v1371_v45 }
 0x92a   :  { %v1373_v20 = vmul.f32 1.442695, %v1372_v46 }
 0x92c   :  { %1970 = vpow2.f32 %v1373_v20 }
 0x939   :  { %v1971_v19 = vpop.eup %1970 }
 0x93a   :  { %v1375_v47 = vsel %vm950_vm4, %v1971_v19, 0.0 }
 0x93b   :  { %1376 = vadd.xlane.f32.xlu1 %v1375_v47 }
 0x9c4   :  { %v1377_v21 = vpop.xlane.xlu1 %1376 }
 0x9c5   :  { %1972 = vrcp.f32 %v1377_v21 }
 0x9d2   :  { %v1973_v37 = vpop.eup %1972 }
 0x9d3   :  { %v1379_v48 = vmul.f32 %v1973_v37, %v1971_v19 }
 0x9d5   :  { %1891 = vmatmul.mubr.msk.f32.vlgmr.msra.gmra.mxu1 %vm962_vm5, %v1379_v48 }
 0x9d6   :  { %1894 = vmatpush3.msra.mxu1 %v2324_v3  ;;  %1901 = vmatprep.mubr.msk.f32.mxu1 %vm1998_vm2, %v1997_v51 }
 0x9d7   :  { %1895 = vmatprep.subr.mxu1 %v1997_v51 }
 0x9d8   :  { %1896 = vmatpush3.msra.mxu1 %v2329_v4 }
 0x9d9   :  { %1897 = vmatprep.subr.mxu1 %v1997_v51 }
 0x9da   :  { %1898 = vmatpush3.msra.mxu1 %v2341_v8 }
 0x9db   :  { %1899 = vmatprep.subr.mxu1 %v1997_v51 }
 0x9dc   :  { %1900 = vmatpush3.msra.mxu1 %v2348_v9 }
 0xa95   :  { %v1449_v27 = vpop.f32.mrf.mxu1 }
 0xa96   :  { %v1454_v52 = vrot.slane %v1449_v27, 4 }
 0xa97   :  { %v1892_v54 = vpop.f32.mrf.mxu1 }
 0xa98   :  { %v1456_v3 = vadd.f32 %v1454_v52, %v2312_v26 }
 0xa9a   :  { %v1458_v56 = vrot.slane %v1456_v3, 4 }
 0xa9c   :  { %1902 = vmatmul.mubr.msk.f32.vlgmr.msra.gmra.mxu1 %vm857_vm3, %v1458_v56 }
 0xb5c   :  { %v1527_v57 = vpop.f32.mrf.mxu1 }
 0xb5d   :  { %v1532_v4 = vrot.slane %v1527_v57, 4 }
 0xb5e   :  { %v1903_v59 = vpop.f32.mrf.mxu1 }
 0xb5f   :  { %v1535_v8 = vsel %vm1534_vm6, %v2378_v49, %v1532_v4 }
 0xb60   :  { %1536 = vst.msk [vmem:[#allocation2] sm:$0xff] %vm48_vm0, %v1535_v8 }
 0xb61   :  { %1985 = shalt.err (!%p1982_p4)
}
 0xb62   :  { %1546 = dma.vmem_to_hbm [thread:$0]  %s1544_s22, 128, %s2438_s6, [#allocation3]  }
 0xb63   :  { %1994 = dma.done.wait [#allocation3], 128  }
 0xb64   :  { %1995 = vsyncadd [#allocation3], 4294967168 }
 0xb65   :  { %1550 = vsyncpa [#allocation3], 1 }

</bundles_post_ra>
